<compile_context>
chip_gen: v7x
topology: tpu7x:2x2x1
jax: 0.10.0
libtpu: 0.0.40
codegen_flags: <defaults>
</compile_context>

<pallas_src>
import math
import numpy as np
import jax
import jax.numpy as jnp
from jax import lax
from jax.experimental import pallas as pl
from jax.experimental.pallas import tpu as pltpu

# ---------------- config (small, consistent with the module) ----------------
S = 8        # sequence length (number of queries)
B = 2        # batch
D = 32       # d_model
H = 4        # nhead
HD = D // H  # head dim
BS = B * S   # total rows (seq-major: row r = s*B + b)
LN_EPS = 1e-5
P_ROWS = 5   # param slab rows: [bq, bv, bo, gamma, beta]

assert B & (B - 1) == 0, "same-batch mask below uses a power-of-two batch trick"


# ------------------------------- Pallas kernel -------------------------------
def self_attn_layer_kernel(x_ref, pos_ref, w_ref, p_ref, out_ref):
    # x_ref / pos_ref / out_ref: full (B*S, D) slab, seq-major rows (s, b).
    x = x_ref[...]                    # (BS, D)  = tgt (value + residual input)
    qk_in = x + pos_ref[...]          # (BS, D)  = tgt + query_pos (fused add)
    w = w_ref[...]                    # (D, 4D)  = [Wq.T | Wk.T | Wv.T | Wo.T]
    pp = p_ref[...]                   # (5, D)   = [bq; bv; bo; gamma; beta]

    # ---- single fused input projection for q, k and v ----
    # stack [x+pos ; x] and hit the full slab once: (2BS, D) @ (D, 4D).
    x2 = jnp.concatenate([qk_in, x], axis=0)                          # (2BS, D)
    proj = jnp.dot(x2, w, preferred_element_type=jnp.float32)         # (2BS, 4D)

    q = proj[:BS, 0:D] + pp[0:1, :]          # + bq
    k = proj[:BS, D:2 * D]                   # bk dropped: softmax-invariant (no masks)
    v = proj[BS:, 2 * D:3 * D] + pp[1:2, :]  # + bv

    scale = 1.0 / math.sqrt(HD)

    # ---- constant same-batch mask (rows are seq-major, batch id = row % B) ----
    rb = lax.broadcasted_iota(jnp.int32, (BS, BS), 0)
    cb = lax.broadcasted_iota(jnp.int32, (BS, BS), 1)
    same_batch = ((rb ^ cb) & (B - 1)) == 0          # exact for power-of-two B

    # ---- attention: pure 2-D matmuls per head, cross-batch entries masked ----
    head_outs = []
    for h in range(H):
        lo = h * HD
        qh = q[:, lo:lo + HD]                                          # (BS, HD)
        kh = k[:, lo:lo + HD]
        vh = v[:, lo:lo + HD]

        s = jnp.einsum('qe,ke->qk', qh, kh,
                       preferred_element_type=jnp.float32) * scale     # (BS, BS)
        s = jnp.where(same_batch, s, -1e30)
        s = s - jnp.max(s, axis=-1, keepdims=True)
        p = jnp.exp(s)                                                  # masked -> 0
        denom = jnp.sum(p, axis=-1, keepdims=True)                      # (BS, 1)
        oh = jnp.dot(p, vh, preferred_element_type=jnp.float32)         # (BS, HD)
        # fold 1/denominator into the (smaller) output instead of scaling P
        head_outs.append(oh * pl.reciprocal(denom, approx=False))
    attn = jnp.concatenate(head_outs, axis=-1)                          # (BS, D)

    # ---- output projection (Wo.T columns of the slab) ----
    proj2 = jnp.dot(attn, w[:, 3 * D:], preferred_element_type=jnp.float32) + pp[2:3, :]

    # ---- residual + LayerNorm (over last dim, biased variance as torch) ----
    res = x + proj2
    mean = jnp.mean(res, axis=-1, keepdims=True)
    cen = res - mean
    var = jnp.mean(cen * cen, axis=-1, keepdims=True)
    out_ref[...] = cen * lax.rsqrt(var + LN_EPS) * pp[3:4, :] + pp[4:5, :]


# ------------------------------- wrapper / packing ----------------------------
def pack_params(params):
    """One-time packing (hoisted out of the per-call path)."""
    wq, wk, wv, bq, bk, bv, wo, bo, gamma, beta = params
    del bk  # exact: with attn_mask=None / key_padding_mask=None the key bias
            # adds a per-query constant to every score -> cancelled by softmax.
    w_slab = jnp.concatenate([wq.T, wk.T, wv.T, wo.T], axis=1)      # (D, 4D)
    p_slab = jnp.concatenate([bq, bv, bo, gamma, beta], axis=0)     # (5, D)
    return w_slab, p_slab


@jax.jit
def self_attention_layer(tgt, query_pos, w_slab, p_slab):
    """tgt, query_pos: (S, B, D) float32 (torch seq-first layout)."""
    # (S, B, D) -> (S*B, D) is a free contiguous reshape; batch grouping is
    # handled inside the kernel by the same-batch mask (no external transposes).
    x = tgt.reshape(BS, D)
    pos = query_pos.reshape(BS, D)

    full = lambda i: (0, 0)
    out = pl.pallas_call(
        self_attn_layer_kernel,
        out_shape=jax.ShapeDtypeStruct((BS, D), jnp.float32),
        grid_spec=pltpu.PrefetchScalarGridSpec(
            num_scalar_prefetch=0,
            grid=(1,),                                   # single invocation
            in_specs=[
                pl.BlockSpec((BS, D), full),             # tgt (value / residual)
                pl.BlockSpec((BS, D), full),             # query_pos
                pl.BlockSpec((D, 4 * D), full),          # [Wq.T|Wk.T|Wv.T|Wo.T]
                pl.BlockSpec((P_ROWS, D), full),         # [bq; bv; bo; gamma; beta]
            ],
            out_specs=pl.BlockSpec((BS, D), full),
        ),
        compiler_params=pltpu.CompilerParams(
            dimension_semantics=("arbitrary",)),          # tiny work: keep on one TC
    )(x, pos, w_slab, p_slab)

    return out.reshape(S, B, D)                           # same row order, free reshape


# --------------------------- parameter construction ---------------------------
def make_params(key):
    k1, k2 = jax.random.split(key, 2)
    # in_proj_weight: (3D, D), xavier_uniform over the full (3D, D) matrix
    bound_in = math.sqrt(6.0 / (3 * D + D))
    in_proj_w = jax.random.uniform(k1, (3 * D, D), jnp.float32, -bound_in, bound_in)
    wq, wk, wv = in_proj_w[:D], in_proj_w[D:2 * D], in_proj_w[2 * D:]
    # in_proj_bias / out_proj.bias default to zeros in nn.MultiheadAttention
    bq = jnp.zeros((1, D), jnp.float32)
    bk = jnp.zeros((1, D), jnp.float32)
    bv = jnp.zeros((1, D), jnp.float32)
    # out_proj.weight: (D, D), xavier_uniform
    bound_out = math.sqrt(6.0 / (D + D))
    wo = jax.random.uniform(k2, (D, D), jnp.float32, -bound_out, bound_out)
    bo = jnp.zeros((1, D), jnp.float32)
    # LayerNorm defaults (1-D params are untouched by _reset_parameters)
    gamma = jnp.ones((1, D), jnp.float32)
    beta = jnp.zeros((1, D), jnp.float32)
    return (wq, wk, wv, bq, bk, bv, wo, bo, gamma, beta)


# ------------------------------ pure-JAX reference ----------------------------
def reference(tgt, query_pos, params):
    wq, wk, wv, bq, bk, bv, wo, bo, gamma, beta = params
    qk = tgt + query_pos                       # (S, B, D)
    q = jnp.einsum('sbd,ed->sbe', qk, wq) + bq[0]
    k = jnp.einsum('sbd,ed->sbe', qk, wk) + bk[0]
    v = jnp.einsum('sbd,ed->sbe', tgt, wv) + bv[0]
    qh = q.reshape(S, B, H, HD)
    kh = k.reshape(S, B, H, HD)
    vh = v.reshape(S, B, H, HD)
    scores = jnp.einsum('sbhd,tbhd->bhst', qh, kh) / math.sqrt(HD)
    p = jax.nn.softmax(scores, axis=-1)
    o = jnp.einsum('bhst,tbhd->sbhd', p, vh).reshape(S, B, D)
    proj = jnp.einsum('sbd,ed->sbe', o, wo) + bo[0]
    res = tgt + proj
    mean = res.mean(-1, keepdims=True)
    var = ((res - mean) ** 2).mean(-1, keepdims=True)
    return (res - mean) / jnp.sqrt(var + LN_EPS) * gamma[0] + beta[0]


if __name__ == "__main__":
    key = jax.random.PRNGKey(0)
    kx, kp, kw = jax.random.split(key, 3)
    tgt = jax.random.normal(kx, (S, B, D), jnp.float32)
    query_pos = jax.random.normal(kp, (S, B, D), jnp.float32)
    params = make_params(kw)
    w_slab, p_slab = pack_params(params)     # once per parameter set

    out = self_attention_layer(tgt, query_pos, w_slab, p_slab)
    out = jax.block_until_ready(out)

    ref = reference(tgt, query_pos, params)
    np.testing.assert_allclose(np.asarray(out), np.asarray(ref), atol=1e-4, rtol=1e-4)

    print("KERNEL_OK")
</pallas_src>

<mosaic_0001>
module attributes {stable_mosaic.version = 11 : i64} {
  func.func @self_attn_layer_kernel(%arg0: i32, %arg1: memref<16x32xf32, #tpu.memory_space<vmem>>, %arg2: memref<16x32xf32, #tpu.memory_space<vmem>>, %arg3: memref<32x128xf32, #tpu.memory_space<vmem>>, %arg4: memref<5x32xf32, #tpu.memory_space<vmem>>, %arg5: memref<16x32xf32, #tpu.memory_space<vmem>>) attributes {dimension_semantics = [#tpu.dimension_semantics<arbitrary>], iteration_bounds = array<i64: 1>, scalar_prefetch = 0 : i64, scratch_operands = 0 : i64, tpu.core_type = #tpu.core_type<tc>, window_params = [{pipeline_mode = #tpu.pipeline_mode<synchronous>, transform_indices = @transform_0, window_bounds = array<i64: 16, 32>}, {pipeline_mode = #tpu.pipeline_mode<synchronous>, transform_indices = @transform_1, window_bounds = array<i64: 16, 32>}, {pipeline_mode = #tpu.pipeline_mode<synchronous>, transform_indices = @transform_2, window_bounds = array<i64: 32, 128>}, {pipeline_mode = #tpu.pipeline_mode<synchronous>, transform_indices = @transform_3, window_bounds = array<i64: 5, 32>}, {pipeline_mode = #tpu.pipeline_mode<synchronous>, transform_indices = @transform_4, window_bounds = array<i64: 16, 32>}]} {
    %c0 = arith.constant 0 : index
    %c0_0 = arith.constant 0 : index
    %0 = vector.load %arg1[%c0, %c0_0] : memref<16x32xf32, #tpu.memory_space<vmem>>, vector<16x32xf32>
    %c0_1 = arith.constant 0 : index
    %c0_2 = arith.constant 0 : index
    %1 = vector.load %arg2[%c0_1, %c0_2] : memref<16x32xf32, #tpu.memory_space<vmem>>, vector<16x32xf32>
    %2 = arith.addf %0, %1 : vector<16x32xf32>
    %c0_3 = arith.constant 0 : index
    %c0_4 = arith.constant 0 : index
    %3 = vector.load %arg3[%c0_3, %c0_4] : memref<32x128xf32, #tpu.memory_space<vmem>>, vector<32x128xf32>
    %c0_5 = arith.constant 0 : index
    %c0_6 = arith.constant 0 : index
    %4 = vector.load %arg4[%c0_5, %c0_6] : memref<5x32xf32, #tpu.memory_space<vmem>>, vector<5x32xf32>
    %5 = tpu.concatenate %2, %0 in 0 : vector<16x32xf32>, vector<16x32xf32> -> vector<32x32xf32>
    %cst = arith.constant dense<0.000000e+00> : vector<32x128xf32>
    %6 = tpu.matmul %5, %3, %cst {dimension_numbers = #tpu.dot_dimension_numbers<[1], [0], [0], [1], [0, 0, 1, 1], [], []>} : vector<32x32xf32>, vector<32x128xf32>, vector<32x128xf32> -> vector<32x128xf32>
    %7 = vector.extract_strided_slice %6 {offsets = [0, 0], sizes = [16, 32], strides = [1, 1]} : vector<32x128xf32> to vector<16x32xf32>
    %8 = vector.extract_strided_slice %4 {offsets = [0, 0], sizes = [1, 32], strides = [1, 1]} : vector<5x32xf32> to vector<1x32xf32>
    %9 = vector.broadcast %8 : vector<1x32xf32> to vector<16x32xf32>
    %10 = arith.addf %7, %9 : vector<16x32xf32>
    %11 = vector.extract_strided_slice %6 {offsets = [0, 32], sizes = [16, 32], strides = [1, 1]} : vector<32x128xf32> to vector<16x32xf32>
    %12 = vector.extract_strided_slice %6 {offsets = [16, 64], sizes = [16, 32], strides = [1, 1]} : vector<32x128xf32> to vector<16x32xf32>
    %13 = vector.extract_strided_slice %4 {offsets = [1, 0], sizes = [1, 32], strides = [1, 1]} : vector<5x32xf32> to vector<1x32xf32>
    %14 = vector.broadcast %13 : vector<1x32xf32> to vector<16x32xf32>
    %15 = arith.addf %12, %14 : vector<16x32xf32>
    %16 = tpu.iota {dimensions = array<i32: 0>} : vector<16x16xi32>
    %17 = tpu.iota {dimensions = array<i32: 1>} : vector<16x16xi32>
    %18 = arith.xori %16, %17 : vector<16x16xi32>
    %c1_i32 = arith.constant 1 : i32
    %19 = vector.broadcast %c1_i32 : i32 to vector<16x16xi32>
    %20 = arith.andi %18, %19 : vector<16x16xi32>
    %c0_i32 = arith.constant 0 : i32
    %21 = vector.broadcast %c0_i32 : i32 to vector<16x16xi32>
    %22 = arith.cmpi eq, %20, %21 : vector<16x16xi32>
    %23 = vector.extract_strided_slice %10 {offsets = [0, 0], sizes = [16, 8], strides = [1, 1]} : vector<16x32xf32> to vector<16x8xf32>
    %24 = vector.extract_strided_slice %11 {offsets = [0, 0], sizes = [16, 8], strides = [1, 1]} : vector<16x32xf32> to vector<16x8xf32>
    %25 = vector.extract_strided_slice %15 {offsets = [0, 0], sizes = [16, 8], strides = [1, 1]} : vector<16x32xf32> to vector<16x8xf32>
    "tpu.trace_start"() <{level = 10 : i32, message = "qe,ke->qk"}> : () -> ()
    %cst_7 = arith.constant dense<0.000000e+00> : vector<16x16xf32>
    %26 = tpu.matmul %23, %24, %cst_7 {dimension_numbers = #tpu.dot_dimension_numbers<[1], [1], [0], [0], [0, 0, 1, 0], [], []>} : vector<16x8xf32>, vector<16x8xf32>, vector<16x16xf32> -> vector<16x16xf32>
    "tpu.trace_stop"() : () -> ()
    %cst_8 = arith.constant 0.353553385 : f32
    %27 = vector.broadcast %cst_8 : f32 to vector<16x16xf32>
    %28 = arith.mulf %26, %27 : vector<16x16xf32>
    %cst_9 = arith.constant -1.000000e+30 : f32
    %29 = vector.broadcast %cst_9 : f32 to vector<16x16xf32>
    %30 = arith.select %22, %28, %29 : vector<16x16xi1>, vector<16x16xf32>
    %cst_10 = arith.constant dense<0xFF800000> : vector<16xf32>
    %31 = vector.multi_reduction <maximumf>, %30, %cst_10 [1] : vector<16x16xf32> to vector<16xf32>
    %32 = vector.shape_cast %31 : vector<16xf32> to vector<16x1xf32>
    %33 = vector.broadcast %32 : vector<16x1xf32> to vector<16x16xf32>
    %34 = arith.subf %30, %33 : vector<16x16xf32>
    %35 = math.exp %34 : vector<16x16xf32>
    %cst_11 = arith.constant dense<0.000000e+00> : vector<16xf32>
    %36 = vector.multi_reduction <add>, %35, %cst_11 [1] : vector<16x16xf32> to vector<16xf32>
    %37 = vector.shape_cast %36 : vector<16xf32> to vector<16x1xf32>
    %cst_12 = arith.constant dense<0.000000e+00> : vector<16x8xf32>
    %38 = tpu.matmul %35, %25, %cst_12 {dimension_numbers = #tpu.dot_dimension_numbers<[1], [0], [0], [1], [0, 0, 1, 1], [], []>} : vector<16x16xf32>, vector<16x8xf32>, vector<16x8xf32> -> vector<16x8xf32>
    %39 = tpu.reciprocal %37 : vector<16x1xf32> -> vector<16x1xf32>
    %40 = vector.broadcast %39 : vector<16x1xf32> to vector<16x8xf32>
    %41 = arith.mulf %38, %40 : vector<16x8xf32>
    %42 = vector.extract_strided_slice %10 {offsets = [0, 8], sizes = [16, 8], strides = [1, 1]} : vector<16x32xf32> to vector<16x8xf32>
    %43 = vector.extract_strided_slice %11 {offsets = [0, 8], sizes = [16, 8], strides = [1, 1]} : vector<16x32xf32> to vector<16x8xf32>
    %44 = vector.extract_strided_slice %15 {offsets = [0, 8], sizes = [16, 8], strides = [1, 1]} : vector<16x32xf32> to vector<16x8xf32>
    "tpu.trace_start"() <{level = 10 : i32, message = "qe,ke->qk"}> : () -> ()
    %cst_13 = arith.constant dense<0.000000e+00> : vector<16x16xf32>
    %45 = tpu.matmul %42, %43, %cst_13 {dimension_numbers = #tpu.dot_dimension_numbers<[1], [1], [0], [0], [0, 0, 1, 0], [], []>} : vector<16x8xf32>, vector<16x8xf32>, vector<16x16xf32> -> vector<16x16xf32>
    "tpu.trace_stop"() : () -> ()
    %cst_14 = arith.constant 0.353553385 : f32
    %46 = vector.broadcast %cst_14 : f32 to vector<16x16xf32>
    %47 = arith.mulf %45, %46 : vector<16x16xf32>
    %cst_15 = arith.constant -1.000000e+30 : f32
    %48 = vector.broadcast %cst_15 : f32 to vector<16x16xf32>
    %49 = arith.select %22, %47, %48 : vector<16x16xi1>, vector<16x16xf32>
    %cst_16 = arith.constant dense<0xFF800000> : vector<16xf32>
    %50 = vector.multi_reduction <maximumf>, %49, %cst_16 [1] : vector<16x16xf32> to vector<16xf32>
    %51 = vector.shape_cast %50 : vector<16xf32> to vector<16x1xf32>
    %52 = vector.broadcast %51 : vector<16x1xf32> to vector<16x16xf32>
    %53 = arith.subf %49, %52 : vector<16x16xf32>
    %54 = math.exp %53 : vector<16x16xf32>
    %cst_17 = arith.constant dense<0.000000e+00> : vector<16xf32>
    %55 = vector.multi_reduction <add>, %54, %cst_17 [1] : vector<16x16xf32> to vector<16xf32>
    %56 = vector.shape_cast %55 : vector<16xf32> to vector<16x1xf32>
    %cst_18 = arith.constant dense<0.000000e+00> : vector<16x8xf32>
    %57 = tpu.matmul %54, %44, %cst_18 {dimension_numbers = #tpu.dot_dimension_numbers<[1], [0], [0], [1], [0, 0, 1, 1], [], []>} : vector<16x16xf32>, vector<16x8xf32>, vector<16x8xf32> -> vector<16x8xf32>
    %58 = tpu.reciprocal %56 : vector<16x1xf32> -> vector<16x1xf32>
    %59 = vector.broadcast %58 : vector<16x1xf32> to vector<16x8xf32>
    %60 = arith.mulf %57, %59 : vector<16x8xf32>
    %61 = vector.extract_strided_slice %10 {offsets = [0, 16], sizes = [16, 8], strides = [1, 1]} : vector<16x32xf32> to vector<16x8xf32>
    %62 = vector.extract_strided_slice %11 {offsets = [0, 16], sizes = [16, 8], strides = [1, 1]} : vector<16x32xf32> to vector<16x8xf32>
    %63 = vector.extract_strided_slice %15 {offsets = [0, 16], sizes = [16, 8], strides = [1, 1]} : vector<16x32xf32> to vector<16x8xf32>
    "tpu.trace_start"() <{level = 10 : i32, message = "qe,ke->qk"}> : () -> ()
    %cst_19 = arith.constant dense<0.000000e+00> : vector<16x16xf32>
    %64 = tpu.matmul %61, %62, %cst_19 {dimension_numbers = #tpu.dot_dimension_numbers<[1], [1], [0], [0], [0, 0, 1, 0], [], []>} : vector<16x8xf32>, vector<16x8xf32>, vector<16x16xf32> -> vector<16x16xf32>
    "tpu.trace_stop"() : () -> ()
    %cst_20 = arith.constant 0.353553385 : f32
    %65 = vector.broadcast %cst_20 : f32 to vector<16x16xf32>
    %66 = arith.mulf %64, %65 : vector<16x16xf32>
    %cst_21 = arith.constant -1.000000e+30 : f32
    %67 = vector.broadcast %cst_21 : f32 to vector<16x16xf32>
    %68 = arith.select %22, %66, %67 : vector<16x16xi1>, vector<16x16xf32>
    %cst_22 = arith.constant dense<0xFF800000> : vector<16xf32>
    %69 = vector.multi_reduction <maximumf>, %68, %cst_22 [1] : vector<16x16xf32> to vector<16xf32>
    %70 = vector.shape_cast %69 : vector<16xf32> to vector<16x1xf32>
    %71 = vector.broadcast %70 : vector<16x1xf32> to vector<16x16xf32>
    %72 = arith.subf %68, %71 : vector<16x16xf32>
    %73 = math.exp %72 : vector<16x16xf32>
    %cst_23 = arith.constant dense<0.000000e+00> : vector<16xf32>
    %74 = vector.multi_reduction <add>, %73, %cst_23 [1] : vector<16x16xf32> to vector<16xf32>
    %75 = vector.shape_cast %74 : vector<16xf32> to vector<16x1xf32>
    %cst_24 = arith.constant dense<0.000000e+00> : vector<16x8xf32>
    %76 = tpu.matmul %73, %63, %cst_24 {dimension_numbers = #tpu.dot_dimension_numbers<[1], [0], [0], [1], [0, 0, 1, 1], [], []>} : vector<16x16xf32>, vector<16x8xf32>, vector<16x8xf32> -> vector<16x8xf32>
    %77 = tpu.reciprocal %75 : vector<16x1xf32> -> vector<16x1xf32>
    %78 = vector.broadcast %77 : vector<16x1xf32> to vector<16x8xf32>
    %79 = arith.mulf %76, %78 : vector<16x8xf32>
    %80 = vector.extract_strided_slice %10 {offsets = [0, 24], sizes = [16, 8], strides = [1, 1]} : vector<16x32xf32> to vector<16x8xf32>
    %81 = vector.extract_strided_slice %11 {offsets = [0, 24], sizes = [16, 8], strides = [1, 1]} : vector<16x32xf32> to vector<16x8xf32>
    %82 = vector.extract_strided_slice %15 {offsets = [0, 24], sizes = [16, 8], strides = [1, 1]} : vector<16x32xf32> to vector<16x8xf32>
    "tpu.trace_start"() <{level = 10 : i32, message = "qe,ke->qk"}> : () -> ()
    %cst_25 = arith.constant dense<0.000000e+00> : vector<16x16xf32>
    %83 = tpu.matmul %80, %81, %cst_25 {dimension_numbers = #tpu.dot_dimension_numbers<[1], [1], [0], [0], [0, 0, 1, 0], [], []>} : vector<16x8xf32>, vector<16x8xf32>, vector<16x16xf32> -> vector<16x16xf32>
    "tpu.trace_stop"() : () -> ()
    %cst_26 = arith.constant 0.353553385 : f32
    %84 = vector.broadcast %cst_26 : f32 to vector<16x16xf32>
    %85 = arith.mulf %83, %84 : vector<16x16xf32>
    %cst_27 = arith.constant -1.000000e+30 : f32
    %86 = vector.broadcast %cst_27 : f32 to vector<16x16xf32>
    %87 = arith.select %22, %85, %86 : vector<16x16xi1>, vector<16x16xf32>
    %cst_28 = arith.constant dense<0xFF800000> : vector<16xf32>
    %88 = vector.multi_reduction <maximumf>, %87, %cst_28 [1] : vector<16x16xf32> to vector<16xf32>
    %89 = vector.shape_cast %88 : vector<16xf32> to vector<16x1xf32>
    %90 = vector.broadcast %89 : vector<16x1xf32> to vector<16x16xf32>
    %91 = arith.subf %87, %90 : vector<16x16xf32>
    %92 = math.exp %91 : vector<16x16xf32>
    %cst_29 = arith.constant dense<0.000000e+00> : vector<16xf32>
    %93 = vector.multi_reduction <add>, %92, %cst_29 [1] : vector<16x16xf32> to vector<16xf32>
    %94 = vector.shape_cast %93 : vector<16xf32> to vector<16x1xf32>
    %cst_30 = arith.constant dense<0.000000e+00> : vector<16x8xf32>
    %95 = tpu.matmul %92, %82, %cst_30 {dimension_numbers = #tpu.dot_dimension_numbers<[1], [0], [0], [1], [0, 0, 1, 1], [], []>} : vector<16x16xf32>, vector<16x8xf32>, vector<16x8xf32> -> vector<16x8xf32>
    %96 = tpu.reciprocal %94 : vector<16x1xf32> -> vector<16x1xf32>
    %97 = vector.broadcast %96 : vector<16x1xf32> to vector<16x8xf32>
    %98 = arith.mulf %95, %97 : vector<16x8xf32>
    %99 = tpu.concatenate %41, %60, %79, %98 in 1 : vector<16x8xf32>, vector<16x8xf32>, vector<16x8xf32>, vector<16x8xf32> -> vector<16x32xf32>
    %100 = vector.extract_strided_slice %3 {offsets = [0, 96], sizes = [32, 32], strides = [1, 1]} : vector<32x128xf32> to vector<32x32xf32>
    %cst_31 = arith.constant dense<0.000000e+00> : vector<16x32xf32>
    %101 = tpu.matmul %99, %100, %cst_31 {dimension_numbers = #tpu.dot_dimension_numbers<[1], [0], [0], [1], [0, 0, 1, 1], [], []>} : vector<16x32xf32>, vector<32x32xf32>, vector<16x32xf32> -> vector<16x32xf32>
    %102 = vector.extract_strided_slice %4 {offsets = [2, 0], sizes = [1, 32], strides = [1, 1]} : vector<5x32xf32> to vector<1x32xf32>
    %103 = vector.broadcast %102 : vector<1x32xf32> to vector<16x32xf32>
    %104 = arith.addf %101, %103 : vector<16x32xf32>
    %105 = arith.addf %0, %104 : vector<16x32xf32>
    %cst_32 = arith.constant dense<0.000000e+00> : vector<16xf32>
    %106 = vector.multi_reduction <add>, %105, %cst_32 [1] : vector<16x32xf32> to vector<16xf32>
    %107 = vector.shape_cast %106 : vector<16xf32> to vector<16x1xf32>
    %cst_33 = arith.constant 3.200000e+01 : f32
    %108 = vector.broadcast %cst_33 : f32 to vector<16x1xf32>
    %109 = arith.divf %107, %108 : vector<16x1xf32>
    %110 = vector.broadcast %109 : vector<16x1xf32> to vector<16x32xf32>
    %111 = arith.subf %105, %110 : vector<16x32xf32>
    %112 = arith.mulf %111, %111 : vector<16x32xf32>
    %cst_34 = arith.constant dense<0.000000e+00> : vector<16xf32>
    %113 = vector.multi_reduction <add>, %112, %cst_34 [1] : vector<16x32xf32> to vector<16xf32>
    %114 = vector.shape_cast %113 : vector<16xf32> to vector<16x1xf32>
    %cst_35 = arith.constant 3.200000e+01 : f32
    %115 = vector.broadcast %cst_35 : f32 to vector<16x1xf32>
    %116 = arith.divf %114, %115 : vector<16x1xf32>
    %cst_36 = arith.constant 9.99999974E-6 : f32
    %117 = vector.broadcast %cst_36 : f32 to vector<16x1xf32>
    %118 = arith.addf %116, %117 : vector<16x1xf32>
    %119 = math.rsqrt %118 : vector<16x1xf32>
    %120 = vector.broadcast %119 : vector<16x1xf32> to vector<16x32xf32>
    %121 = arith.mulf %111, %120 : vector<16x32xf32>
    %122 = vector.extract_strided_slice %4 {offsets = [3, 0], sizes = [1, 32], strides = [1, 1]} : vector<5x32xf32> to vector<1x32xf32>
    %123 = vector.broadcast %122 : vector<1x32xf32> to vector<16x32xf32>
    %124 = arith.mulf %121, %123 : vector<16x32xf32>
    %125 = vector.extract_strided_slice %4 {offsets = [4, 0], sizes = [1, 32], strides = [1, 1]} : vector<5x32xf32> to vector<1x32xf32>
    %126 = vector.broadcast %125 : vector<1x32xf32> to vector<16x32xf32>
    %127 = arith.addf %124, %126 : vector<16x32xf32>
    %c0_37 = arith.constant 0 : index
    %c0_38 = arith.constant 0 : index
    %128 = vector.load %arg5[%c0_37, %c0_38] : memref<16x32xf32, #tpu.memory_space<vmem>>, vector<16x32xf32>
    tpu.vector_store %arg5[%c0_37, %c0_38], %127 {strides = array<i32>} : memref<16x32xf32, #tpu.memory_space<vmem>>, vector<16x32xf32>,
    return
  }
  func.func @transform_0(%arg0: i32) -> (i32, i32) {
    %c0_i32 = arith.constant 0 : i32
    %c0_i32_0 = arith.constant 0 : i32
    %c0_i32_1 = arith.constant 0 : i32
    return %c0_i32, %c0_i32_0 : i32, i32
  }
  func.func @transform_1(%arg0: i32) -> (i32, i32) {
    %c0_i32 = arith.constant 0 : i32
    %c0_i32_0 = arith.constant 0 : i32
    %c0_i32_1 = arith.constant 0 : i32
    return %c0_i32, %c0_i32_0 : i32, i32
  }
  func.func @transform_2(%arg0: i32) -> (i32, i32) {
    %c0_i32 = arith.constant 0 : i32
    %c0_i32_0 = arith.constant 0 : i32
    %c0_i32_1 = arith.constant 0 : i32
    return %c0_i32, %c0_i32_0 : i32, i32
  }
  func.func @transform_3(%arg0: i32) -> (i32, i32) {
    %c0_i32 = arith.constant 0 : i32
    %c0_i32_0 = arith.constant 0 : i32
    %c0_i32_1 = arith.constant 0 : i32
    return %c0_i32, %c0_i32_0 : i32, i32
  }
  func.func @transform_4(%arg0: i32) -> (i32, i32) {
    %c0_i32 = arith.constant 0 : i32
    %c0_i32_0 = arith.constant 0 : i32
    %c0_i32_1 = arith.constant 0 : i32
    return %c0_i32, %c0_i32_0 : i32, i32
  }
}

</mosaic_0001>

<bundles_post_ra>
// kernel: self_attention_layer.1
= control target key start
LH: loop header
LB: loop body
LE: loop exit
PB: predicated region body
PF: predicated region fallthrough
CT: control target
= control target key end

     0   :  { %9 = vsyncpa [#allocation3], 0  ;;  %s1926_s0 = inlined_call_operand.hbm [shape: f32[16,32], index: 0, kind: input, shape index: {}]   ;;  %s1927_s1 = inlined_call_operand.hbm [shape: f32[16,32], index: 1, kind: input, shape index: {}]   ;;  %s1928_s2 = inlined_call_operand.hbm [shape: f32[32,128], index: 2, kind: input, shape index: {}]   ;;  %s1929_s3 = inlined_call_operand.vmem [shape: f32[5,32], index: 3, kind: input, shape index: {}]   ;;  %s1930_s4 = inlined_call_operand.hbm [shape: f32[16,32], index: 4, kind: output, shape index: {}]  }
   0x1   :  { %10 = vsyncpa [#allocation6], 0 }
   0x2   :  { %11 = vsyncpa [#allocation4], 0  ;;  %s1621_s15 = smov [#allocation5]   ;;  %s1622_s17 = smov [#allocation2]  }
   0x3   :  { %s29_s16 = sshll.u32 %s1621_s15, 4  ;;  %s17_s18 = sshll.u32 %s1622_s17, 4  ;;  %s30_s16 = int_to_ptr.vmem [resolvable:$true] %s29_s16  ;;  %s1666_s18 = int_to_ptr.vmem [resolvable:$true] %s17_s18 }
   0x4   :  { %s1527_s21 = scalar_lea.hbm %s1927_s1, 256 }
   0x5   :  { %p1528_p0 = scmp.ne.s32.totalorder %s1927_s1, %s1527_s21  ;;  %p1531_p1 = scmp.lt.u32.totalorder %s1527_s21, %s1927_s1 }
   0x7   :  { %p1533_p2 = pnand %p1531_p1, %p1528_p0 }
   0x9   :  { %1536 = shalt.err (!%p1533_p2)
}
   0xa   :  { %s1537_s26 = scalar_lea.vmem %s30_s16, 256  ;;  %p1542_p4 = scmp.lt.s32.totalorder %s30_s16, %s30_s16 }
   0xb   :  { %p1538_p3 = scmp.ne.s32.totalorder %s30_s16, %s1537_s26  ;;  %p1543_p5 = scmp.lt.s32.totalorder %s1537_s26, %s1537_s26 }
   0xd   :  { %p1544_p6 = por %p1543_p5, %p1542_p4 }
   0xf   :  { %p1545_p7 = pnand %p1544_p6, %p1538_p3 }
  0x11   :  { %1548 = shalt.err (!%p1545_p7)
}
  0x12   :  { %s1623_s27 = smov 128   ;;  %s1624_s28 = smov 8  }
  0x13   :  { %35 = dma.hbm_to_vmem [thread:$0]  %s1927_s1, 256, %s30_s16, [#allocation6], %s1623_s27, %s1623_s27, %s1624_s28  }
  0x14   :  { %s1549_s7 = scalar_lea.hbm %s1926_s0, 256 }
  0x15   :  { %p1550_p8 = scmp.ne.s32.totalorder %s1926_s0, %s1549_s7  ;;  %p1553_p9 = scmp.lt.u32.totalorder %s1549_s7, %s1926_s0 }
  0x17   :  { %p1555_p10 = pnand %p1553_p9, %p1550_p8 }
  0x19   :  { %1558 = shalt.err (!%p1555_p10)
}
  0x1a   :  { %s1559_s12 = scalar_lea.vmem %s1666_s18, 256  ;;  %p1564_p12 = scmp.lt.s32.totalorder %s1666_s18, %s1666_s18 }
  0x1b   :  { %p1560_p11 = scmp.ne.s32.totalorder %s1666_s18, %s1559_s12  ;;  %p1565_p13 = scmp.lt.s32.totalorder %s1559_s12, %s1559_s12 }
  0x1d   :  { %p1566_p0 = por %p1565_p13, %p1564_p12 }
  0x1f   :  { %p1567_p1 = pnand %p1566_p0, %p1560_p11 }
  0x21   :  { %1570 = shalt.err (!%p1567_p1)
}
  0x22   :  { %23 = dma.hbm_to_vmem [thread:$0]  %s1926_s0, 256, %s1666_s18, [#allocation3], %s1623_s27, %s1623_s27, %s1624_s28  }
  0x23   :  { %s1625_s14 = smov [#allocation7]   ;;  %s1571_s19 = scalar_lea.hbm %s1928_s2, 512 }
  0x24   :  { %s41_s15 = sshll.u32 %s1625_s14, 4  ;;  %p1572_p2 = scmp.ne.s32.totalorder %s1928_s2, %s1571_s19  ;;  %s42_s15 = int_to_ptr.vmem [resolvable:$true] %s41_s15 }
  0x25   :  { %p1575_p3 = scmp.lt.u32.totalorder %s1571_s19, %s1928_s2 }
  0x27   :  { %p1577_p4 = pnand %p1575_p3, %p1572_p2 }
  0x29   :  { %1580 = shalt.err (!%p1577_p4)
}
  0x2a   :  { %s1581_s24 = scalar_lea.vmem %s42_s15, 512  ;;  %p1586_p6 = scmp.lt.s32.totalorder %s42_s15, %s42_s15 }
  0x2b   :  { %p1582_p5 = scmp.ne.s32.totalorder %s42_s15, %s1581_s24  ;;  %p1587_p7 = scmp.lt.s32.totalorder %s1581_s24, %s1581_s24 }
  0x2d   :  { %p1588_p8 = por %p1587_p7, %p1586_p6 }
  0x2f   :  { %p1589_p9 = pnand %p1588_p8, %p1582_p5 }
  0x31   :  { %1592 = shalt.err (!%p1589_p9)
}
  0x32   :  { %47 = dma.hbm_to_vmem [thread:$0]  %s1928_s2, 512, %s42_s15, [#allocation6], %s1623_s27, %s1623_s27, %s1624_s28  }
  0x33   :  { %1615 = dma.done.wait [#allocation3], 256  }
  0x34   :  { %1616 = vsyncadd [#allocation3], 4294967040 }
  0x35   :  { %1617 = dma.done.wait [#allocation6], 768  }
  0x36   :  { %1618 = vsyncadd [#allocation6], 4294966528  ;;  %v1718_v0 = vld [vmem:[#allocation7] sm:$0xff]  ;;  %v1720_v1 = vld [vmem:[#allocation7 + $0x8] sm:$0xff]  ;;  %vm70_vm0 = vcmask 261120   ;;  %v168_v13 = vlaneseq  ;;  %vm201_vm1 = vcmask 64512  }
  0x37   :  { %v1722_v2 = vld [vmem:[#allocation7 + $0x10] sm:$0xff]  ;;  %v1481_v3 = vpack.i.bf16 %v1720_v1, %v1718_v0  ;;  %v1365_v4 = vpack.c.bf16 %v1720_v1, %v1718_v0  ;;  %v1728_v5 = vld [vmem:[#allocation7 + $0x18] sm:$0xff]  ;;  %v1730_v6 = vld [vmem:[#allocation2] sm:$0xff]  ;;  %s1626_s26 = smov 96   ;;  %s1627_s29 = smov 120   ;;  %vm291_vm4 = vcmask 130048  }
  0x38   :  { %v61_v7 = vld [vmem:[#allocation5] sm:$0xff]  ;;  %v1369_v8 = vpack.c.bf16 %v1728_v5, %v1722_v2  ;;  %v1736_v10 = vld [vmem:[#allocation2 + $0x8] sm:$0xff]  ;;  %v62_v11 = vld [vmem:[#allocation5 + $0x8] sm:$0xff]  ;;  %v1745_v14 = vshrl.u32 %v168_v13, 7  ;;  %s1629_s30 = smov 80   ;;  %s1630_s5 = smov 112  }
  0x39   :  { %v63_v9 = vadd.f32 %v61_v7, %v1730_v6  ;;  %1366 = vmatprep.subr.bf16.mxu0 %v1365_v4  ;;  %v64_v12 = vadd.f32 %v62_v11, %v1736_v10  ;;  %v1751_v16 = vld [vmem:[%s1929_s3] sm:$0x1f]  ;;  %s1628_s3 = smov 88   ;;  %s1631_s6 = smov 64   ;;  %vm1775_vm2 = vmpackc.low %vm201_vm1, %vm201_vm1  ;;  %v188_v53 = vand.u32 127, %v168_v13  ;;  %vm1043_vm6 = vcmask 195584  }
  0x3a   :  { %1368 = vmatpush3.bf16.msra.mxu0 %v1365_v4  ;;  %v170_v15 = vsub.s32 0, %v1745_v14  ;;  %v176_v23 = vsub.s32 1, %v1745_v14  ;;  %v186_v52 = vadd.s32 8, %v1745_v14  ;;  %s1632_s7 = smov 48   ;;  %s1633_s8 = smov 56  }
  0x3b   :  { %1292 = vmatprep.mubr.msk.f32.mxu0 %vm70_vm0, %v63_v9  ;;  %1370 = vmatprep.subr.bf16.mxu0 %v1369_v8  ;;  %v189_v56 = vxor.u32 %v188_v53, %v1745_v14  ;;  %s1634_s9 = smov 104   ;;  %s1635_s10 = smov 72  }
  0x3c   :  { %v171_v17 = vrot.slane %v1751_v16, %v170_v15  ;;  %v177_v26 = vrot.slane %v1751_v16, %v176_v23  ;;  %v190_v54 = vxor.u32 %v188_v53, %v186_v52  ;;  %s1636_s11 = smov 40   ;;  %s1637_s12 = smov 32  }
  0x3d   :  { %v1806_v60 = vand.u32 1, %v189_v56  ;;  %s1638_s1 = smov 16   ;;  %s1639_s13 = smov 24  }
  0x3e   :  { %1372 = vmatpush3.bf16.msra.mxu0 %v1369_v8  ;;  %v1802_v55 = vand.u32 1, %v190_v54  ;;  %s1640_s14 = smov [#allocation8]  }
  0x3f   :  { %vm193_vm5 = vcmp.eq.s32.totalorder %v1806_v60, 0  ;;  %s1195_s15 = sshll.u32 %s1640_s14, 4  ;;  %s1196_s15 = int_to_ptr.vmem [resolvable:$true] %s1195_s15 }
  0x40   :  { %vm194_vm3 = vcmp.eq.s32.totalorder %v1802_v55, 0  ;;  %s1593_s16 = scalar_lea.vmem %s1196_s15, 256  ;;  %p1598_p11 = scmp.lt.s32.totalorder %s1196_s15, %s1196_s15 }
  0x41   :  { %1293 = vmatmul.mubr.msk.f32.vlgmr.msra.gmra.mrb[0].mxu0 %vm70_vm0, %v64_v12  ;;  %p1594_p10 = scmp.ne.s32.totalorder %s1196_s15, %s1593_s16  ;;  %p1599_p12 = scmp.lt.s32.totalorder %s1593_s16, %s1593_s16 }
  0x42   :  { %1295 = vmatprep.mubr.msk.f32.mxu0 %vm70_vm0, %v1730_v6 }
  0x43   :  { %p1600_p13 = por %p1599_p12, %p1598_p11 }
  0x45   :  { %1296 = vmatmul.mubr.msk.f32.gmra.mrb[2].mxu0 %vm70_vm0, %v1736_v10  ;;  %p1601_p0 = pnand %p1600_p13, %p1594_p10 }
 0x114   :  { %v1294_v18 = vpop.f32.mrb[0].mxu0 }
 0x115   :  { %v149_v19 = vpop.f32.mrb[1].mxu0  ;;  %v1764_v22 = vadd.f32 %v1294_v18, %v171_v17 }
 0x116   :  { %v1754_v20 = vpack.i.bf16 %v1294_v18, %v149_v19  ;;  %v1756_v21 = vadd.f32 %v171_v17, %v149_v19 }
 0x118   :  { %1442 = vrot.lane.b32.xlu0 %v1754_v20, %s1626_s26  ;;  %403 = vrot.lane.b32.xlu1 %v1756_v21, %s1627_s29  ;;  %v1297_v24 = vpop.f32.mrb[2].mxu0 }
 0x119   :  { %1302 = vmatprep.mubr.msk.f32.mxu1 %vm201_vm1, %v1756_v21  ;;  %v159_v25 = vpop.f32.mrb[3].mxu0 }
 0x11c   :  { %1447 = vrot.lane.b32.xlu0 %v1754_v20, %s1628_s3  ;;  %1452 = vrot.lane.b32.xlu1 %v1754_v20, %s1629_s30 }
 0x120   :  { %405 = vrot.lane.b32.xlu0 %v1764_v22, %s1627_s29  ;;  %607 = vrot.lane.b32.xlu1 %v1756_v21, %s1630_s5 }
 0x124   :  { %609 = vrot.lane.b32.xlu0 %v1764_v22, %s1630_s5  ;;  %179 = vrot.lane.b32.xlu1 %v177_v26, %s1631_s6 }
 0x18a   :  { %v1443_v27 = vpop.permute.xlu0 %1442  ;;  %v404_v28 = vpop.permute.xlu1 %403 }
 0x18b   :  { %v1445_v29 = vunpack.i.h.bf16 %v1443_v27  ;;  %v1444_v30 = vunpack.i.l.bf16 %v1443_v27  ;;  %1316 = vmatprep.mubr.msk.f32.mxu0 %vm201_vm1, %v404_v28 }
 0x18d   :  { %v1373_v32 = vpack.c.bf16 %v1445_v29, %v1444_v30 }
 0x18e   :  { %v1448_v33 = vpop.permute.xlu0 %1447  ;;  %v1453_v34 = vpop.permute.xlu1 %1452 }
 0x18f   :  { %v1450_v35 = vunpack.i.h.bf16 %v1448_v33  ;;  %v1449_v36 = vunpack.i.l.bf16 %v1448_v33  ;;  %v1455_v37 = vunpack.i.h.bf16 %v1453_v34  ;;  %v1454_v38 = vunpack.i.l.bf16 %v1453_v34  ;;  %1375 = vmatprep.subr.msk.bf16.mxu1 %vm1775_vm2, %v1373_v32 }
 0x190   :  { %1378 = vmatpush3.bf16.xpose.msk.msra.mxu1 %vm1775_vm2, %v1373_v32 }
 0x191   :  { %v1383_v39 = vpack.c.bf16 %v1450_v35, %v1449_v36  ;;  %v1393_v40 = vpack.c.bf16 %v1455_v37, %v1454_v38 }
 0x192   :  { %v608_v41 = vpop.permute.xlu1 %607  ;;  %v406_v43 = vpop.permute.xlu0 %405 }
 0x193   :  { %1385 = vmatprep.subr.msk.bf16.mxu0 %vm1775_vm2, %v1383_v39 }
 0x194   :  { %1388 = vmatpush3.bf16.xpose.msk.msra.mxu0 %vm1775_vm2, %v1383_v39 }
 0x195   :  { %1395 = vmatprep.subr.msk.bf16.mxu0 %vm1775_vm2, %v1393_v40 }
 0x196   :  { %v180_v42 = vpop.permute.xlu1 %179  ;;  %v610_v47 = vpop.permute.xlu0 %609 }
 0x197   :  { %1303 = vmatmul.mubr.msk.f32.vlgmr.msra.gmra.mrb[0].mxu1 %vm201_vm1, %v1764_v22  ;;  %v183_v44 = vadd.f32 %v1297_v24, %v180_v42  ;;  %v182_v45 = vadd.f32 %v180_v42, %v159_v25 }
 0x199   :  { %v1795_v46 = vpack.i.bf16 %v183_v44, %v182_v45 }
 0x19b   :  { %1317 = vmatmul.mubr.msk.f32.vlgmr.msra.gmra.mrb[4].mxu0 %vm201_vm1, %v406_v43  ;;  %1457 = vrot.lane.b32.xlu1 %v1795_v46, %s1631_s6 }
 0x19c   :  { %1398 = vmatpush3.bf16.xpose.msk.msra.mxu0 %vm1775_vm2, %v1393_v40  ;;  %1330 = vmatprep.mubr.msk.f32.mxu0 %vm201_vm1, %v608_v41 }
 0x1a3   :  { %1331 = vmatmul.mubr.msk.f32.vlgmr.msra.gmra.mrb[6].mxu0 %vm201_vm1, %v610_v47 }
 0x20d   :  { %v1458_v48 = vpop.permute.xlu1 %1457 }
 0x20e   :  { %v1460_v49 = vunpack.i.h.bf16 %v1458_v48  ;;  %v1459_v50 = vunpack.i.l.bf16 %v1458_v48 }
 0x210   :  { %v1379_v51 = vpack.c.bf16 %v1460_v49, %v1459_v50 }
 0x212   :  { %1380 = vmatprep.subr.bf16.mxu1 %v1379_v51 }
 0x213   :  { %1382 = vmatpush3.bf16.msra.mxu1 %v1379_v51 }
 0x26a   :  { %v1304_v57 = vpop.f32.mrb[0].mxu1 }
 0x26b   :  { %v288_v58 = vmul.f32 0.35355338, %v1304_v57  ;;  %v278_v59 = vpop.f32.mrb[1].mxu1 }
 0x26c   :  { %v287_v4 = vmul.f32 0.35355338, %v278_v59 }
 0x26d   :  { %v290_v61 = vsel %vm194_vm3, %v288_v58, -1e+30 }
 0x26e   :  { %v1318_v62 = vpop.f32.mrb[4].mxu0  ;;  %v295_v63 = vsel %vm291_vm4, %v290_v61, -inf  ;;  %v289_v13 = vsel %vm193_vm5, %v287_v4, -1e+30 }
 0x26f   :  { %v495_v7 = vmul.f32 0.35355338, %v1318_v62  ;;  %v485_v8 = vpop.f32.mrb[5].mxu0  ;;  %296 = vmax.xlane.f32.xlu1 %v295_v63  ;;  %v292_v17 = vsel %vm291_vm4, %v289_v13, -inf }
 0x270   :  { %v494_v12 = vmul.f32 0.35355338, %v485_v8 }
 0x271   :  { %v497_v9 = vsel %vm194_vm3, %v495_v7, -1e+30 }
 0x272   :  { %v501_v11 = vsel %vm291_vm4, %v497_v9, -inf  ;;  %v496_v23 = vsel %vm193_vm5, %v494_v12, -1e+30 }
 0x273   :  { %502 = vmax.xlane.f32.xlu0 %v501_v11  ;;  %v498_v24 = vsel %vm291_vm4, %v496_v23, -inf }
 0x276   :  { %v1332_v15 = vpop.f32.mrb[6].mxu0 }
 0x277   :  { %v699_v18 = vmul.f32 0.35355338, %v1332_v15  ;;  %293 = vmax.xlane.f32.xlu0 %v292_v17  ;;  %v689_v19 = vpop.f32.mrb[7].mxu0 }
 0x278   :  { %v698_v27 = vmul.f32 0.35355338, %v689_v19 }
 0x279   :  { %v701_v25 = vsel %vm194_vm3, %v699_v18, -1e+30 }
 0x27a   :  { %v705_v26 = vsel %vm291_vm4, %v701_v25, -inf  ;;  %v700_v28 = vsel %vm193_vm5, %v698_v27, -1e+30 }
 0x27b   :  { %499 = vmax.xlane.f32.xlu0 %v498_v24  ;;  %v702_v29 = vsel %vm291_vm4, %v700_v28, -inf }
 0x27f   :  { %706 = vmax.xlane.f32.xlu0 %v705_v26 }
 0x280   :  { %1467 = vrot.lane.b32.xlu1 %v1795_v46, %s1632_s7 }
 0x295   :  { %1462 = vrot.lane.b32.xlu0 %v1795_v46, %s1633_s8 }
 0x299   :  { %811 = vrot.lane.b32.xlu0 %v1756_v21, %s1634_s9 }
 0x2a4   :  { %703 = vmax.xlane.f32.xlu1 %v702_v29 }
 0x2b5   :  { %1472 = vrot.lane.b32.xlu1 %v1754_v20, %s1635_s10 }
 0x2b9   :  { %813 = vrot.lane.b32.xlu1 %v1764_v22, %s1634_s9 }
 0x2fc   :  { %v297_v30 = vpop.xlane.xlu1 %296 }
 0x2fd   :  { %v299_v33 = vsub.f32 %v290_v61, %v297_v30 }
 0x2ff   :  { %v302_v36 = vmul.f32 1.442695, %v299_v33 }
 0x300   :  { %v503_v32 = vpop.xlane.xlu0 %502  ;;  %v1468_v20 = vpop.permute.xlu1 %1467 }
 0x301   :  { %v505_v37 = vsub.f32 %v497_v9, %v503_v32  ;;  %v1470_v22 = vunpack.i.h.bf16 %v1468_v20  ;;  %v1469_v44 = vunpack.i.l.bf16 %v1468_v20 }
 0x303   :  { %v508_v40 = vmul.f32 1.442695, %v505_v37  ;;  %v1399_v51 = vpack.c.bf16 %v1470_v22, %v1469_v44 }
 0x304   :  { %v294_v34 = vpop.xlane.xlu0 %293 }
 0x305   :  { %v298_v35 = vsub.f32 %v289_v13, %v294_v34 }
 0x307   :  { %v300_v21 = vmul.f32 1.442695, %v298_v35 }
 0x308   :  { %v500_v38 = vpop.xlane.xlu0 %499 }
 0x309   :  { %1491 = vpow2.f32 %v300_v21  ;;  %v504_v39 = vsub.f32 %v496_v23, %v500_v38 }
 0x30a   :  { %1493 = vpow2.f32 %v302_v36 }
 0x30b   :  { %v506_v41 = vmul.f32 1.442695, %v504_v39 }
 0x30c   :  { %v707_v42 = vpop.xlane.xlu0 %706 }
 0x30d   :  { %1495 = vpow2.f32 %v506_v41  ;;  %v709_v54 = vsub.f32 %v701_v25, %v707_v42 }
 0x30e   :  { %1497 = vpow2.f32 %v508_v40 }
 0x30f   :  { %v712_v58 = vmul.f32 1.442695, %v709_v54 }
 0x310   :  { %v1463_v43 = vpop.permute.xlu0 %1462 }
 0x311   :  { %v1465_v45 = vunpack.i.h.bf16 %v1463_v43  ;;  %v1464_v47 = vunpack.i.l.bf16 %v1463_v43 }
 0x313   :  { %v1832_v48 = vpop.eup %1491  ;;  %v1389_v49 = vpack.c.bf16 %v1465_v45, %v1464_v47 }
 0x314   :  { %v1834_v50 = vpop.eup %1493  ;;  %1309 = vmatprep.mubr.msk.f32.mxu1 %vm291_vm4, %v1832_v48  ;;  %v812_v9 = vpop.permute.xlu0 %811  ;;  %v304_v44 = vsel %vm291_vm4, %v1832_v48, 0.0  ;;  %v1486_v48 = vpack.i.bf16 %v1728_v5, %v1722_v2 }
 0x315   :  { %1310 = vmatmul.mubr.msk.f32.vlgmr.msra.gmra.mrb[2].mxu1 %vm291_vm4, %v1834_v50  ;;  %1390 = vmatprep.subr.bf16.mxu1 %v1389_v49  ;;  %v307_v45 = vsel %vm291_vm4, %v1834_v50, 0.0 }
 0x316   :  { %1392 = vmatpush3.bf16.msra.mxu1 %v1389_v49 }
 0x317   :  { %v1496_v52 = vpop.eup %1495  ;;  %1400 = vmatprep.subr.bf16.mxu1 %v1399_v51 }
 0x318   :  { %v1498_v53 = vpop.eup %1497  ;;  %1323 = vmatprep.mubr.msk.f32.mxu1 %vm291_vm4, %v1496_v52  ;;  %v510_v30 = vsel %vm291_vm4, %v1496_v52, 0.0 }
 0x319   :  { %1324 = vmatmul.mubr.msk.f32.vlgmr.msra.gmra.mrb[4].mxu1 %vm291_vm4, %v1498_v53  ;;  %v513_v32 = vsel %vm291_vm4, %v1498_v53, 0.0 }
 0x31a   :  { %1402 = vmatpush3.bf16.msra.mxu1 %v1399_v51 }
 0x331   :  { %v704_v56 = vpop.xlane.xlu1 %703 }
 0x332   :  { %v708_v57 = vsub.f32 %v700_v28, %v704_v56 }
 0x334   :  { %v710_v59 = vmul.f32 1.442695, %v708_v57 }
 0x335   :  { %v1473_v61 = vpop.permute.xlu1 %1472 }
 0x336   :  { %1499 = vpow2.f32 %v710_v59  ;;  %v1475_v62 = vunpack.i.h.bf16 %v1473_v61  ;;  %v1474_v63 = vunpack.i.l.bf16 %v1473_v61 }
 0x337   :  { %1501 = vpow2.f32 %v712_v58 }
 0x338   :  { %v1403_v4 = vpack.c.bf16 %v1475_v62, %v1474_v63 }
 0x339   :  { %v814_v11 = vpop.permute.xlu1 %813 }
 0x33a   :  { %1405 = vmatprep.subr.msk.bf16.mxu1 %vm1775_vm2, %v1403_v4 }
 0x340   :  { %v1500_v7 = vpop.eup %1499 }
 0x341   :  { %v1502_v8 = vpop.eup %1501  ;;  %1337 = vmatprep.mubr.msk.f32.mxu1 %vm291_vm4, %v1500_v7  ;;  %v714_v33 = vsel %vm291_vm4, %v1500_v7, 0.0 }
 0x342   :  { %1338 = vmatmul.mubr.msk.f32.vlgmr.msra.gmra.mrb[6].mxu1 %vm291_vm4, %v1502_v8  ;;  %v717_v55 = vsel %vm291_vm4, %v1502_v8, 0.0 }
 0x343   :  { %1408 = vmatpush3.bf16.xpose.msk.msra.mxu1 %vm1775_vm2, %v1403_v4  ;;  %1344 = vmatprep.mubr.msk.f32.mxu1 %vm201_vm1, %v812_v9 }
 0x34a   :  { %1345 = vmatmul.mubr.msk.f32.vlgmr.msra.gmra.mrb[8].mxu1 %vm201_vm1, %v814_v11 }
 0x3e8   :  { %v1850_v12 = vpop.f32.mrb[2].mxu1 }
 0x3e9   :  { %v1852_v13 = vpop.f32.mrb[3].mxu1 }
 0x3ec   :  { %v1854_v15 = vpop.f32.mrb[4].mxu1 }
 0x3ed   :  { %v594_v17 = vpop.f32.mrb[5].mxu1 }
 0x415   :  { %v1856_v18 = vpop.f32.mrb[6].mxu1 }
 0x416   :  { %v1858_v19 = vpop.f32.mrb[7].mxu1 }
 0x41d   :  { %v1346_v23 = vpop.f32.mrb[8].mxu1 }
 0x41e   :  { %v903_v24 = vmul.f32 0.35355338, %v1346_v23  ;;  %v893_v31 = vpop.f32.mrb[9].mxu1 }
 0x41f   :  { %v902_v25 = vmul.f32 0.35355338, %v893_v31 }
 0x420   :  { %v905_v26 = vsel %vm194_vm3, %v903_v24, -1e+30 }
 0x421   :  { %v909_v27 = vsel %vm291_vm4, %v905_v26, -inf  ;;  %v904_v28 = vsel %vm193_vm5, %v902_v25, -1e+30 }
 0x422   :  { %910 = vmax.xlane.f32.xlu1 %v909_v27  ;;  %v906_v29 = vsel %vm291_vm4, %v904_v28, -inf }
 0x423   :  { %907 = vmax.xlane.f32.xlu0 %v906_v29 }
 0x426   :  { %511 = vadd.xlane.f32.xlu1 %v510_v30 }
 0x42a   :  { %514 = vadd.xlane.f32.xlu1 %v513_v32 }
 0x42e   :  { %715 = vadd.xlane.f32.xlu1 %v714_v33 }
 0x432   :  { %718 = vadd.xlane.f32.xlu1 %v717_v55 }
 0x439   :  { %1477 = vrot.lane.b32.xlu0 %v1795_v46, %s1636_s11 }
 0x4af   :  { %v911_v60 = vpop.xlane.xlu1 %910 }
 0x4b0   :  { %v913_v34 = vsub.f32 %v905_v26, %v911_v60  ;;  %v908_v35 = vpop.xlane.xlu0 %907 }
 0x4b1   :  { %v912_v36 = vsub.f32 %v904_v28, %v908_v35 }
 0x4b2   :  { %v916_v37 = vmul.f32 1.442695, %v913_v34 }
 0x4b3   :  { %v914_v21 = vmul.f32 1.442695, %v912_v36  ;;  %v512_v22 = vpop.xlane.xlu1 %511  ;;  %v1048_v36 = vsub.s32 2, %v1745_v14 }
 0x4b4   :  { %1503 = vpow2.f32 %v916_v37  ;;  %v1478_v38 = vpop.permute.xlu0 %1477 }
 0x4b5   :  { %1505 = vpow2.f32 %v914_v21  ;;  %v1480_v39 = vunpack.i.h.bf16 %v1478_v38  ;;  %v1479_v40 = vunpack.i.l.bf16 %v1478_v38  ;;  %v1049_v37 = vrot.slane %v1751_v16, %v1048_v36 }
 0x4b6   :  { %1507 = vrcp.f32 %v512_v22 }
 0x4b7   :  { %v1409_v41 = vpack.c.bf16 %v1480_v39, %v1479_v40  ;;  %v515_v47 = vpop.xlane.xlu1 %514 }
 0x4b8   :  { %1509 = vrcp.f32 %v515_v47 }
 0x4b9   :  { %1410 = vmatprep.subr.bf16.mxu1 %v1409_v41 }
 0x4ba   :  { %1412 = vmatpush3.bf16.msra.mxu1 %v1409_v41 }
 0x4bb   :  { %v716_v51 = vpop.xlane.xlu1 %715 }
 0x4bc   :  { %1511 = vrcp.f32 %v716_v51 }
 0x4be   :  { %v1504_v42 = vpop.eup %1503 }
 0x4bf   :  { %v1506_v20 = vpop.eup %1505  ;;  %v921_v43 = vsel %vm291_vm4, %v1504_v42, 0.0  ;;  %v719_v53 = vpop.xlane.xlu1 %718 }
 0x4c0   :  { %922 = vadd.xlane.f32.xlu0 %v921_v43  ;;  %1351 = vmatprep.mubr.msk.f32.mxu1 %vm291_vm4, %v1506_v20  ;;  %v918_v46 = vsel %vm291_vm4, %v1506_v20, 0.0  ;;  %v1508_v49 = vpop.eup %1507  ;;  %1513 = vrcp.f32 %v719_v53 }
 0x4c1   :  { %919 = vadd.xlane.f32.xlu1 %v918_v46  ;;  %1352 = vmatmul.mubr.msk.f32.vlgmr.msra.gmra.mrb[10].mxu1 %vm291_vm4, %v1504_v42  ;;  %v605_v52 = vmul.f32 %v1508_v49, %v594_v17 }
 0x4c2   :  { %v1510_v50 = vpop.eup %1509 }
 0x4c3   :  { %v606_v54 = vmul.f32 %v1510_v50, %v1854_v15 }
 0x4c5   :  { %305 = vadd.xlane.f32.xlu1 %v304_v44 }
 0x4c6   :  { %v1512_v56 = vpop.eup %1511 }
 0x4c7   :  { %v809_v57 = vmul.f32 %v1512_v56, %v1858_v19 }
 0x4c9   :  { %308 = vadd.xlane.f32.xlu1 %v307_v45 }
 0x4ca   :  { %v1514_v58 = vpop.eup %1513 }
 0x4cb   :  { %v810_v59 = vmul.f32 %v1514_v58, %v1856_v18  ;;  %v1178_v58 = vsub.s32 3, %v1745_v14 }
 0x4d6   :  { %1017 = vrot.lane.b32.xlu0 %v605_v52, %s1624_s28 }
 0x4da   :  { %1482 = vrot.lane.b32.xlu1 %v1481_v3, %s1637_s12 }
 0x4de   :  { %1487 = vrot.lane.b32.xlu1 %v1486_v48, %s1637_s12 }
 0x4e2   :  { %1019 = vrot.lane.b32.xlu1 %v606_v54, %s1624_s28 }
 0x4e6   :  { %1025 = vrot.lane.b32.xlu1 %v809_v57, %s1638_s1 }
 0x4ea   :  { %1027 = vrot.lane.b32.xlu1 %v810_v59, %s1638_s1  ;;  %v1184_v59 = vsub.s32 4, %v1745_v14 }
 0x54d   :  { %v923_v18 = vpop.xlane.xlu0 %922 }
 0x54e   :  { %v920_v0 = vpop.xlane.xlu1 %919 }
 0x551   :  { %v1018_v29 = vpop.permute.xlu0 %1017 }
 0x552   :  { %v306_v1 = vpop.xlane.xlu1 %305 }
 0x553   :  { %1515 = vrcp.f32 %v306_v1 }
 0x556   :  { %v309_v2 = vpop.xlane.xlu1 %308 }
 0x557   :  { %1517 = vrcp.f32 %v309_v2 }
 0x558   :  { %1519 = vrcp.f32 %v920_v0  ;;  %v1179_v0 = vrot.slane %v1751_v16, %v1178_v58 }
 0x559   :  { %1521 = vrcp.f32 %v923_v18 }
 0x55a   :  { %v1483_v3 = vpop.permute.xlu1 %1482 }
 0x55b   :  { %v1485_v5 = vunpack.i.h.bf16 %v1483_v3  ;;  %v1484_v61 = vunpack.i.l.bf16 %v1483_v3  ;;  %v1185_v3 = vrot.slane %v1751_v16, %v1184_v59 }
 0x55d   :  { %v1516_v62 = vpop.eup %1515  ;;  %v1413_v63 = vpack.c.bf16 %v1485_v5, %v1484_v61 }
 0x55e   :  { %v1488_v4 = vpop.permute.xlu1 %1487  ;;  %v401_v7 = vmul.f32 %v1516_v62, %v1852_v13 }
 0x55f   :  { %v1490_v8 = vunpack.i.h.bf16 %v1488_v4  ;;  %v1489_v9 = vunpack.i.l.bf16 %v1488_v4  ;;  %1414 = vmatprep.subr.bf16.mxu0 %v1413_v63 }
 0x560   :  { %1416 = vmatpush3.bf16.msra.mxu0 %v1413_v63 }
 0x561   :  { %v1518_v11 = vpop.eup %1517  ;;  %v1417_v15 = vpack.c.bf16 %v1490_v8, %v1489_v9 }
 0x562   :  { %v402_v17 = vmul.f32 %v1518_v11, %v1850_v12  ;;  %v1520_v23 = vpop.eup %1519  ;;  %v1020_v26 = vpop.permute.xlu1 %1019  ;;  %v1039_v12 = vsel %vm201_vm1, %v401_v7, %v1018_v29 }
 0x563   :  { %1418 = vmatprep.subr.bf16.mxu0 %v1417_v15  ;;  %v1522_v13 = vpop.eup %1521 }
 0x564   :  { %1420 = vmatpush3.bf16.msra.mxu0 %v1417_v15  ;;  %v1040_v55 = vsel %vm201_vm1, %v402_v17, %v1020_v26 }
 0x566   :  { %v1026_v27 = vpop.permute.xlu1 %1025 }
 0x567   :  { %v1041_v30 = vsel %vm291_vm4, %v1039_v12, %v1026_v27 }
 0x56a   :  { %v1028_v28 = vpop.permute.xlu1 %1027 }
 0x56b   :  { %v1042_v60 = vsel %vm291_vm4, %v1040_v55, %v1028_v28 }
 0x594   :  { %v1353_v19 = vpop.f32.mrb[10].mxu1 }
 0x595   :  { %v1002_v24 = vpop.f32.mrb[11].mxu1  ;;  %v1014_v25 = vmul.f32 %v1522_v13, %v1353_v19 }
 0x596   :  { %v1013_v31 = vmul.f32 %v1520_v23, %v1002_v24 }
 0x598   :  { %1033 = vrot.lane.b32.xlu1 %v1013_v31, %s1639_s13 }
 0x59c   :  { %1035 = vrot.lane.b32.xlu1 %v1014_v25, %s1639_s13 }
 0x60a   :  { %v1034_v32 = vpop.permute.xlu1 %1033 }
 0x60b   :  { %v1044_v33 = vsel %vm1043_vm6, %v1041_v30, %v1034_v32 }
 0x60c   :  { %1362 = vmatprep.mubr.msk.f32.mxu0 %vm70_vm0, %v1044_v33 }
 0x60e   :  { %v1036_v34 = vpop.permute.xlu1 %1035 }
 0x60f   :  { %v1045_v35 = vsel %vm1043_vm6, %v1042_v60, %v1036_v34 }
 0x610   :  { %1363 = vmatmul.mubr.msk.f32.vlgmr.msra.gmra.mrb[8].mxu0 %vm70_vm0, %v1045_v35 }
 0x6e3   :  { %v1364_v21 = vpop.f32.mrb[8].mxu0 }
 0x6e4   :  { %v1144_v38 = vadd.f32 %v1364_v21, %v1049_v37  ;;  %v1138_v39 = vpop.f32.mrb[9].mxu0 }
 0x6e5   :  { %v1139_v40 = vadd.f32 %v1138_v39, %v1049_v37 }
 0x6e6   :  { %v1148_v41 = vadd.f32 %v1144_v38, %v1736_v10 }
 0x6e7   :  { %v1147_v42 = vadd.f32 %v1139_v40, %v1730_v6 }
 0x6e8   :  { %v1152_v20 = vsel %vm70_vm0, %v1148_v41, 0.0 }
 0x6e9   :  { %1153 = vadd.xlane.f32.xlu0 %v1152_v20  ;;  %v1149_v43 = vsel %vm70_vm0, %v1147_v42, 0.0 }
 0x6ea   :  { %1150 = vadd.xlane.f32.xlu1 %v1149_v43 }
 0x776   :  { %v1154_v46 = vpop.xlane.xlu0 %1153 }
 0x777   :  { %v1157_v22 = vmul.f32 0.03125, %v1154_v46  ;;  %v1151_v44 = vpop.xlane.xlu1 %1150 }
 0x778   :  { %v1156_v45 = vmul.f32 0.03125, %v1151_v44 }
 0x779   :  { %v1159_v47 = vsub.f32 %v1148_v41, %v1157_v22 }
 0x77a   :  { %v1158_v49 = vsub.f32 %v1147_v42, %v1156_v45 }
 0x77b   :  { %v1161_v53 = vmul.f32 %v1159_v47, %v1159_v47 }
 0x77c   :  { %v1160_v51 = vmul.f32 %v1158_v49, %v1158_v49 }
 0x77d   :  { %v1165_v10 = vsel %vm70_vm0, %v1161_v53, 0.0 }
 0x77e   :  { %v1162_v52 = vsel %vm70_vm0, %v1160_v51, 0.0 }
 0x77f   :  { %1163 = vadd.xlane.f32.xlu0 %v1162_v52 }
 0x783   :  { %1166 = vadd.xlane.f32.xlu0 %v1165_v10 }
 0x80c   :  { %v1164_v6 = vpop.xlane.xlu0 %1163 }
 0x80d   :  { %v1168_v48 = vmul.f32 0.03125, %v1164_v6 }
 0x80f   :  { %v1170_v50 = vadd.f32 1e-05, %v1168_v48 }
 0x810   :  { %v1167_v54 = vpop.xlane.xlu0 %1166 }
 0x811   :  { %1523 = vrsqrt.f32 %v1170_v50  ;;  %v1169_v56 = vmul.f32 0.03125, %v1167_v54 }
 0x813   :  { %v1171_v57 = vadd.f32 1e-05, %v1169_v56 }
 0x815   :  { %1525 = vrsqrt.f32 %v1171_v57 }
 0x81b   :  { %v1524_v1 = vpop.eup %1523 }
 0x81c   :  { %v1174_v2 = vmul.f32 %v1524_v1, %v1158_v49 }
 0x81e   :  { %v1180_v5 = vmul.f32 %v1179_v0, %v1174_v2 }
 0x81f   :  { %v1526_v61 = vpop.eup %1525 }
 0x820   :  { %v1175_v62 = vmul.f32 %v1526_v61, %v1159_v47  ;;  %v1186_v63 = vadd.f32 %v1185_v3, %v1180_v5 }
 0x822   :  { %v1181_v4 = vmul.f32 %v1179_v0, %v1175_v62  ;;  %1188 = vst.msk [vmem:[#allocation8] sm:$0xff] %vm70_vm0, %v1186_v63 }
 0x824   :  { %v1187_v7 = vadd.f32 %v1185_v3, %v1181_v4 }
 0x826   :  { %1189 = vst.msk [vmem:[#allocation8 + $0x8] sm:$0xff] %vm70_vm0, %v1187_v7 }
 0x827   :  { %1604 = shalt.err (!%p1601_p0)
}
 0x828   :  { %s1605_s20 = scalar_lea.hbm %s1930_s4, 256 }
 0x829   :  { %p1606_p1 = scmp.ne.s32.totalorder %s1930_s4, %s1605_s20  ;;  %p1609_p2 = scmp.lt.u32.totalorder %s1605_s20, %s1930_s4 }
 0x82b   :  { %p1611_p3 = pnand %p1609_p2, %p1606_p1 }
 0x82d   :  { %1614 = shalt.err (!%p1611_p3)
}
 0x82e   :  { %1201 = dma.vmem_to_hbm [thread:$0]  %s1196_s15, 256, %s1930_s4, [#allocation4], %s1623_s27, %s1623_s27, %s1624_s28  }
 0x82f   :  { %1619 = dma.done.wait [#allocation4], 256  }
 0x830   :  { %1620 = vsyncadd [#allocation4], 4294967040 }
 0x831   :  { %1205 = vsyncpa [#allocation3], 1 }
 0x832   :  { %1206 = vsyncpa [#allocation6], 1 }
 0x833   :  { %1207 = vsyncpa [#allocation4], 1 }

</bundles_post_ra>
